<compile_context>
chip_gen: v6e
topology: v6e:2x2x1
jax: 0.10.0
libtpu: 0.0.40
codegen_flags: <defaults>
</compile_context>

<pallas_src>
import functools

import jax
import jax.numpy as jnp
from jax import lax
from jax.experimental import pallas as pl
from jax.experimental.pallas import tpu as pltpu


# 32 MiB scoped VMEM: safe on v5e/v6e (128 MiB physical) and v7x (64 MiB physical).
# v6e with bf16 inputs can afford to raise this and grow the tiles.
VMEM_LIMIT_BYTES = 32 * 1024 * 1024


def _pick_tile(dim, target):
    """Largest candidate tile <= target that divides dim (falls back to full dim)."""
    for cand in (min(target, dim), 512, 256, 128, 64, 32, 16, 8):
        if 0 < cand <= dim and dim % cand == 0:
            return cand
    return dim


# -----------------------------------------------------------------------------
# Linear projection kernels (row-tiled, weight resident)
# -----------------------------------------------------------------------------
def _linear_kernel(x_ref, w_ref, o_ref):
    # x: (tm, K), w: (K, N)  ->  o: (tm, N); f32 accumulate on the MXU.
    o_ref[...] = jnp.dot(
        x_ref[...], w_ref[...], preferred_element_type=jnp.float32
    ).astype(o_ref.dtype)


def _linear_bias_kernel(x_ref, w_ref, b_ref, o_ref):
    acc = jnp.dot(x_ref[...], w_ref[...], preferred_element_type=jnp.float32)
    o_ref[...] = (acc + b_ref[...].astype(jnp.float32)).astype(o_ref.dtype)


def pallas_linear(x2d, w, b=None, *, tm=256):
    """x2d: (R, K) @ w: (K, N) [+ b] -> (R, N), streaming tm-row tiles of x/out."""
    R, K = x2d.shape
    _, N = w.shape
    tm = min(tm, R)
    grid = (pl.cdiv(R, tm),)
    cparams = pltpu.CompilerParams(
        dimension_semantics=("parallel",),          # shards row tiles across TCs (v7x)
        vmem_limit_bytes=VMEM_LIMIT_BYTES,
    )
    # NOTE: K (<= ~1.3k channels for this module) is kept as one block; tile K with an
    # accumulator only if the reduction dim grows large.
    if b is None:
        return pl.pallas_call(
            _linear_kernel,
            out_shape=jax.ShapeDtypeStruct((R, N), x2d.dtype),
            grid=grid,
            in_specs=[
                pl.BlockSpec((tm, K), lambda i: (i, 0)),
                pl.BlockSpec((K, N), lambda i: (0, 0)),    # weight resident
            ],
            out_specs=pl.BlockSpec((tm, N), lambda i: (i, 0)),
            compiler_params=cparams,
        )(x2d, w)

    b2d = b.reshape(1, N)
    return pl.pallas_call(
        _linear_bias_kernel,
        out_shape=jax.ShapeDtypeStruct((R, N), x2d.dtype),
        grid=grid,
        in_specs=[
            pl.BlockSpec((tm, K), lambda i: (i, 0)),
            pl.BlockSpec((K, N), lambda i: (0, 0)),
            pl.BlockSpec((1, N), lambda i: (0, 0)),
        ],
        out_specs=pl.BlockSpec((tm, N), lambda i: (i, 0)),
        compiler_params=cparams,
    )(x2d, w, b2d)


# -----------------------------------------------------------------------------
# Flash-style attention kernel (fused-head layout, online softmax)
# -----------------------------------------------------------------------------
def _flash_attn_kernel(q_ref, k_ref, v_ref, o_ref, m_ref, l_ref, acc_ref,
                       *, heads, dim_head, scale):
    # q: (1, tq, H*D), k/v: (1, tkv, H*D), o: (1, tq, H*D)
    # scratch: m/l: (H, tq, 1) f32, acc: (H, tq, D) f32
    kv = pl.program_id(2)
    nkv = pl.num_programs(2)

    @pl.when(kv == 0)
    def _init():
        m_ref[...] = jnp.full(m_ref.shape, -jnp.inf, jnp.float32)
        l_ref[...] = jnp.zeros(l_ref.shape, jnp.float32)
        acc_ref[...] = jnp.zeros(acc_ref.shape, jnp.float32)

    for h in range(heads):                      # small static unroll over heads
        lo = h * dim_head
        hi = lo + dim_head

        qh = q_ref[0, :, lo:hi] * scale         # (tq, D); scale folded into q
        kh = k_ref[0, :, lo:hi]                 # (tkv, D)
        vh = v_ref[0, :, lo:hi]                 # (tkv, D)

        # q @ k^T without materializing a transpose: contract the D axes directly.
        s = lax.dot_general(
            qh, kh,
            dimension_numbers=(((1,), (1,)), ((), ())),
            preferred_element_type=jnp.float32,
        )                                        # (tq, tkv) f32

        m_prev = m_ref[h]                        # (tq, 1)
        l_prev = l_ref[h]
        m_new = jnp.maximum(m_prev, jnp.max(s, axis=-1, keepdims=True))
        alpha = jnp.exp(m_prev - m_new)
        p = jnp.exp(s - m_new)                   # f32 softmax numerator

        l_ref[h] = alpha * l_prev + jnp.sum(p, axis=-1, keepdims=True)
        acc_ref[h] = alpha * acc_ref[h] + jnp.dot(
            p.astype(vh.dtype), vh, preferred_element_type=jnp.float32
        )
        m_ref[h] = m_new

    @pl.when(kv == nkv - 1)
    def _finalize():
        # Assemble all heads into one lane-dense (tq, H*D) store.
        outs = []
        for h in range(heads):
            inv_l = pl.reciprocal(l_ref[h], approx=True)    # EUP rcp, ~free
            outs.append(acc_ref[h] * inv_l)
        o_ref[0] = jnp.concatenate(outs, axis=-1).astype(o_ref.dtype)


def pallas_flash_attention(q, k, v, *, heads, dim_head, scale, tq=128, tkv=128):
    """q: (B, N, H*D), k/v: (B, M, H*D) -> (B, N, H*D) (fused-head layout)."""
    B, N, inner = q.shape
    _, M, _ = k.shape
    assert inner == heads * dim_head
    tq = _pick_tile(N, tq)
    tkv = _pick_tile(M, tkv)
    grid = (B, N // tq, M // tkv)

    kernel = functools.partial(
        _flash_attn_kernel, heads=heads, dim_head=dim_head, scale=scale)

    itemsize = jnp.dtype(q.dtype).itemsize
    cost = pl.CostEstimate(
        flops=4 * B * heads * N * M * dim_head,             # QK^T + PV
        transcendentals=B * heads * N * M,                  # exp
        bytes_accessed=(q.size + k.size + v.size + q.size) * itemsize,
    )

    return pl.pallas_call(
        kernel,
        out_shape=jax.ShapeDtypeStruct((B, N, inner), q.dtype),
        grid=grid,
        in_specs=[
            pl.BlockSpec((1, tq, inner), lambda b, qi, ki: (b, qi, 0)),
            pl.BlockSpec((1, tkv, inner), lambda b, qi, ki: (b, ki, 0)),
            pl.BlockSpec((1, tkv, inner), lambda b, qi, ki: (b, ki, 0)),
        ],
        out_specs=pl.BlockSpec((1, tq, inner), lambda b, qi, ki: (b, qi, 0)),
        scratch_shapes=[
            pltpu.VMEM((heads, tq, 1), jnp.float32),         # running max m
            pltpu.VMEM((heads, tq, 1), jnp.float32),         # running sum l
            pltpu.VMEM((heads, tq, dim_head), jnp.float32),  # accumulator
        ],
        compiler_params=pltpu.CompilerParams(
            dimension_semantics=("parallel", "parallel", "arbitrary"),
            vmem_limit_bytes=VMEM_LIMIT_BYTES,
        ),
        cost_estimate=cost,
    )(q, k, v)


# -----------------------------------------------------------------------------
# CrossAttention module (forward semantics of the PyTorch reference)
# -----------------------------------------------------------------------------
def init_cross_attention_params(key, query_dim, context_dim=None, heads=8, dim_head=64):
    context_dim = query_dim if context_dim is None else context_dim
    inner_dim = dim_head * heads
    k0, k1, k2, k3 = jax.random.split(key, 4)
    # Stored as (in, out) so kernels compute x @ W directly (PyTorch stores (out, in)).
    return {
        "wq": jax.random.normal(k0, (query_dim, inner_dim), jnp.float32) * (query_dim ** -0.5),
        "wk": jax.random.normal(k1, (context_dim, inner_dim), jnp.float32) * (context_dim ** -0.5),
        "wv": jax.random.normal(k2, (context_dim, inner_dim), jnp.float32) * (context_dim ** -0.5),
        "wo": jax.random.normal(k3, (inner_dim, query_dim), jnp.float32) * (inner_dim ** -0.5),
        "bo": jnp.zeros((query_dim,), jnp.float32),
    }


def cross_attention_forward(params, x, context=None, heads=8, dim_head=64):
    if context is None:
        context = x
    B, N, Dq = x.shape
    _, M, Dc = context.shape
    inner_dim = heads * dim_head
    scale = dim_head ** (-0.5)

    # Projections (kept in fused-head layout: no (b h) split/merge HBM round-trips).
    q = pallas_linear(x.reshape(B * N, Dq), params["wq"]).reshape(B, N, inner_dim)
    k = pallas_linear(context.reshape(B * M, Dc), params["wk"]).reshape(B, M, inner_dim)
    v = pallas_linear(context.reshape(B * M, Dc), params["wv"]).reshape(B, M, inner_dim)

    out = pallas_flash_attention(q, k, v, heads=heads, dim_head=dim_head, scale=scale)

    # to_out: Linear(inner_dim, query_dim) + Dropout (eval / p=0.0 -> identity)
    y = pallas_linear(out.reshape(B * N, inner_dim), params["wo"], params["bo"])
    return y.reshape(B, N, Dq)


# Pure-JAX reference for sanity checking.
def cross_attention_ref(params, x, context=None, heads=8, dim_head=64):
    if context is None:
        context = x
    B, N, Dq = x.shape
    _, M, Dc = context.shape
    scale = dim_head ** (-0.5)
    q = x @ params["wq"]
    k = context @ params["wk"]
    v = context @ params["wv"]

    def split(t, L):
        return t.reshape(B, L, heads, dim_head).transpose(0, 2, 1, 3)

    qh, kh, vh = split(q, N), split(k, M), split(v, M)
    sim = jnp.einsum("bhid,bhjd->bhij", qh, kh) * scale
    p = jax.nn.softmax(sim, axis=-1)
    out = jnp.einsum("bhij,bhjd->bhid", p, vh)
    out = out.transpose(0, 2, 1, 3).reshape(B, N, heads * dim_head)
    return out @ params["wo"] + params["bo"]


if __name__ == "__main__":
    key = jax.random.PRNGKey(0)
    kp, kx, kc = jax.random.split(key, 3)

    # Small but tile-exercising shapes: 2 q-tiles, 2 kv-tiles, 2 row-tiles per linear.
    B, N, M = 2, 256, 256
    heads, dim_head = 2, 64           # inner_dim = 128 (lane-dense output)
    query_dim, context_dim = 64, 64

    params = init_cross_attention_params(kp, query_dim, context_dim, heads, dim_head)
    x = jax.random.normal(kx, (B, N, query_dim), jnp.float32)
    context = jax.random.normal(kc, (B, M, context_dim), jnp.float32)

    y = cross_attention_forward(params, x, context, heads=heads, dim_head=dim_head)
    y = jax.block_until_ready(y)

    y_ref = cross_attention_ref(params, x, context, heads=heads, dim_head=dim_head)
    assert y.shape == (B, N, query_dim)
    assert jnp.allclose(y, y_ref, atol=1e-2, rtol=1e-2), "mismatch vs JAX reference"

    print("KERNEL_OK")
</pallas_src>

<mosaic_0001>
module attributes {stable_mosaic.version = 11 : i64} {
  func.func @_linear_kernel(%arg0: i32, %arg1: memref<256x64xf32, #tpu.memory_space<vmem>>, %arg2: memref<64x128xf32, #tpu.memory_space<vmem>>, %arg3: memref<256x128xf32, #tpu.memory_space<vmem>>) attributes {dimension_semantics = [#tpu.dimension_semantics<parallel>], iteration_bounds = array<i64: 2>, scalar_prefetch = 0 : i64, scratch_operands = 0 : i64, tpu.core_type = #tpu.core_type<tc>, window_params = [{transform_indices = @transform_0, window_bounds = array<i64: 256, 64>}, {pipeline_mode = #tpu.pipeline_mode<synchronous>, transform_indices = @transform_1, window_bounds = array<i64: 64, 128>}, {transform_indices = @transform_2, window_bounds = array<i64: 256, 128>}]} {
    %c0 = arith.constant 0 : index
    %c0_0 = arith.constant 0 : index
    %0 = vector.load %arg1[%c0, %c0_0] : memref<256x64xf32, #tpu.memory_space<vmem>>, vector<256x64xf32>
    %c0_1 = arith.constant 0 : index
    %c0_2 = arith.constant 0 : index
    %1 = vector.load %arg2[%c0_1, %c0_2] : memref<64x128xf32, #tpu.memory_space<vmem>>, vector<64x128xf32>
    %cst = arith.constant dense<0.000000e+00> : vector<256x128xf32>
    %2 = tpu.matmul %0, %1, %cst {dimension_numbers = #tpu.dot_dimension_numbers<[1], [0], [0], [1], [0, 0, 1, 1], [], []>} : vector<256x64xf32>, vector<64x128xf32>, vector<256x128xf32> -> vector<256x128xf32>
    %c0_3 = arith.constant 0 : index
    %c0_4 = arith.constant 0 : index
    %3 = vector.load %arg3[%c0_3, %c0_4] : memref<256x128xf32, #tpu.memory_space<vmem>>, vector<256x128xf32>
    tpu.vector_store %arg3[%c0_3, %c0_4], %2 {strides = array<i32>} : memref<256x128xf32, #tpu.memory_space<vmem>>, vector<256x128xf32>,
    return
  }
  func.func @transform_0(%arg0: i32) -> (i32, i32) {
    %c0_i32 = arith.constant 0 : i32
    %c0_i32_0 = arith.constant 0 : i32
    return %arg0, %c0_i32 : i32, i32
  }
  func.func @transform_1(%arg0: i32) -> (i32, i32) {
    %c0_i32 = arith.constant 0 : i32
    %c0_i32_0 = arith.constant 0 : i32
    %c0_i32_1 = arith.constant 0 : i32
    return %c0_i32, %c0_i32_0 : i32, i32
  }
  func.func @transform_2(%arg0: i32) -> (i32, i32) {
    %c0_i32 = arith.constant 0 : i32
    %c0_i32_0 = arith.constant 0 : i32
    return %arg0, %c0_i32 : i32, i32
  }
}

</mosaic_0001>

<bundles_post_ra>
// kernel: tpu_custom_call.1
= control target key start
LH: loop header
LB: loop body
LE: loop exit
PB: predicated region body
PF: predicated region fallthrough
CT: control target
= control target key end

     0   :  { %7 = vsyncpa [#allocation3], 0  ;;  %s1131_s0 = inlined_call_operand.vmem [shape: f32[512,64], index: 0, kind: input, shape index: {}]   ;;  %s1132_s1 = inlined_call_operand.vmem [shape: f32[64,128], index: 1, kind: input, shape index: {}]   ;;  %s1133_s2 = inlined_call_operand.hbm [shape: f32[512,128], index: 2, kind: output, shape index: {}]  }
   0x1   :  { %9 = vsyncpa [#allocation3 + $0x1], 0  ;;  %s901_s9 = smov 0   ;;  %s903_s10 = smov 0  }
   0x2   :  { %s905_s11 = smov 0   ;;  %s907_s12 = smov 0  }
   0x3 LB: > { %s922_s13 = sadd.s32 4294967295, %s881_s12   ;;  %s615_s14 = sadd.s32 4294967294, %s881_s12   ;;  %s881_s12 = sphi %s907_s12, %s1139_s12   ;;  %s877_s11 = sphi %s905_s11, %s1138_s11   ;;  %s873_s10 = sphi %s903_s10, %s1137_s10   ;;  %s869_s9 = sphi %s901_s9, %s1136_s9  }
   0x4   : > { %s926_s15 = sadd.s32 1, %s881_s12   ;;  %s69_s16 = sadd.s32 1, %s877_s11 }
   0x5   : > { %s66_s17 = ssub.s32 %s881_s12, %s926_s15  ;;  %p79_p0 = scmp.ne.s32.totalorder %s877_s11, %s873_s10 }
   0x6   : > { %p67_p1 = scmp.eq.s32.totalorder %s66_s17, 0  ;;  %p80_p2 = scmp.eq.s32.totalorder %s922_s13, 1 }
   0x7   : > { %p85_p3 = scmp.ne.s32.totalorder %s873_s10, %s869_s9  ;;  %p86_p4 = scmp.eq.s32.totalorder %s615_s14, 1 }
   0x8   : > { %s937_s18 = scalar_select %p67_p1, %s877_s11, %s69_s16  }
   0x9   : > { %p939_p5 = por %p80_p2, %p79_p0  ;;  %p943_p6 = por %p86_p4, %p85_p3 }
   0xa   : > { %p618_p7 = scmp.ge.s32.totalorder %s881_s12, 1  ;;  %p116_p8 = scmp.lt.s32.totalorder %s881_s12, 3 }
   0xc   : > { %p117_p9 = pnand %p618_p7, %p116_p8 }
   0xd   : > { %s620_s25 = sshll.u32 (!%p117_p9), %s922_s13, 5  ;;  %s135_s23 = sand.u32 (!%p117_p9), 1, %s873_s10  }
   0xe   : > { %120 = sbr.rel (%p117_p9) target bundleno = 274 (0x112), region = 28  ;;  %p139_p10 = scmp.lt.s32.totalorder (!%p117_p9), %s620_s25, 63 }
   0xf   : > { %s619_s24 = sshll.u32 (!%p117_p9), %s135_s23, 8  ;;  %s659_s26 = sshll.u32 (!%p117_p9), %s922_s13, 12 }
  0x10   : > { %s1081_s30 = scalar_lea.hbm (!%p117_p9), %s1133_s2, %s659_s26  ;;  %s1091_s13 = scalar_lea.sflag (!%p117_p9), [#allocation3], %s135_s23 }
  0x11   : > { %s883_s4 = smov (!%p117_p9), [#allocation2]  }
  0x12   : > { %s825_s5 = sshll.u32 (!%p117_p9), %s883_s4, 4  ;;  %s826_s5 = int_to_ptr.vmem [resolvable:$false] %s825_s5 }
  0x13   : > { %v184_v0 = vld [vmem:[%s1132_s1 + $0x38] sm:$0xff]  ;;  %v183_v1 = vld [vmem:[%s1132_s1 + $0x30] sm:$0xff]  ;;  %v182_v2 = vld [vmem:[%s1132_s1 + $0x28] sm:$0xff]  ;;  %s1141_s25 = smov (!%p139_p10, %s620_s25), 63  ;;  %vm185_vm0 = vcmask 523264  }
  0x14   : > { %700 = vmatprep.subr.mxu0 %v184_v0  ;;  %764 = vmatprep.subr.mxu1 %v184_v0  ;;  %v181_v3 = vld [vmem:[%s1132_s1 + $0x20] sm:$0xff]  ;;  %v180_v4 = vld [vmem:[%s1132_s1 + $0x18] sm:$0xff]  ;;  %v179_v5 = vld [vmem:[%s1132_s1 + $0x10] sm:$0xff]  ;;  %s621_s6 = sshll.u32 %s1141_s25, 3  ;;  %s1046_s25 = scalar_lea.vmem [#allocation2], %s619_s24 }
  0x15   : > { %701 = vmatpush3.msra.mxu0 %v184_v0  ;;  %772 = vmatpush3.msra.mxu1 %v184_v0  ;;  %v178_v6 = vld [vmem:[%s1132_s1 + $0x8] sm:$0xff]  ;;  %s974_s17 = scalar_lea.vmem %s1131_s0, %s621_s6  ;;  %v177_v7 = vld [vmem:[%s1132_s1] sm:$0xff]  ;;  %s553_s27 = sshll.u32 %s1046_s25, 4  ;;  %s1083_s27 = int_to_ptr.vmem [resolvable:$true] %s553_s27 }
  0x16   : > { %702 = vmatprep.subr.mxu0 %v183_v1  ;;  %765 = vmatprep.subr.mxu1 %v183_v1  ;;  %v145_v8 = vld [vmem:[%s974_s17] sm:$0xff]  ;;  %v146_v10 = vld [vmem:[%s974_s17 + $0x8] sm:$0xff]  ;;  %v147_v12 = vld [vmem:[%s974_s17 + $0x10] sm:$0xff]  ;;  %s821_s3 = scalar_lea.vmem %s1083_s27, 4096  ;;  %s827_s6 = scalar_lea.vmem %s826_s5, 8192 }
  0x17   : > { %703 = vmatpush3.msra.mxu0 %v183_v1  ;;  %773 = vmatpush3.msra.mxu1 %v183_v1  ;;  %v161_v9 = vld [vmem:[%s974_s17 + $0x80] sm:$0xff]  ;;  %v162_v11 = vld [vmem:[%s974_s17 + $0x88] sm:$0xff]  ;;  %v163_v13 = vld [vmem:[%s974_s17 + $0x90] sm:$0xff]  ;;  %p822_p11 = scmp.ne.s32.totalorder %s1083_s27, %s821_s3  ;;  %p828_p0 = scmp.lt.s32.totalorder %s1083_s27, %s826_s5 }
  0x18   : > { %704 = vmatprep.subr.mxu0 %v182_v2  ;;  %766 = vmatprep.subr.mxu1 %v182_v2  ;;  %v148_v14 = vld [vmem:[%s974_s17 + $0x18] sm:$0xff]  ;;  %v149_v16 = vld [vmem:[%s974_s17 + $0x20] sm:$0xff]  ;;  %v150_v18 = vld [vmem:[%s974_s17 + $0x28] sm:$0xff]  ;;  %p829_p1 = scmp.lt.s32.totalorder %s827_s6, %s821_s3 }
  0x19   : > { %705 = vmatpush3.msra.mxu0 %v182_v2  ;;  %774 = vmatpush3.msra.mxu1 %v182_v2  ;;  %v164_v15 = vld [vmem:[%s974_s17 + $0x98] sm:$0xff]  ;;  %v165_v17 = vld [vmem:[%s974_s17 + $0xa0] sm:$0xff]  ;;  %v166_v19 = vld [vmem:[%s974_s17 + $0xa8] sm:$0xff]  ;;  %p823_p12 = pnand %p822_p11, %p939_p5 }
  0x1a   : > { %706 = vmatprep.subr.mxu0 %v181_v3  ;;  %767 = vmatprep.subr.mxu1 %v181_v3  ;;  %v151_v20 = vld [vmem:[%s974_s17 + $0x30] sm:$0xff]  ;;  %v152_v22 = vld [vmem:[%s974_s17 + $0x38] sm:$0xff]  ;;  %v153_v24 = vld [vmem:[%s974_s17 + $0x40] sm:$0xff]  ;;  %p830_p2 = por %p829_p1, %p828_p0 }
  0x1b   : > { %707 = vmatpush3.msra.mxu0 %v181_v3  ;;  %775 = vmatpush3.msra.mxu1 %v181_v3  ;;  %v167_v21 = vld [vmem:[%s974_s17 + $0xb0] sm:$0xff]  ;;  %v168_v23 = vld [vmem:[%s974_s17 + $0xb8] sm:$0xff]  ;;  %v169_v25 = vld [vmem:[%s974_s17 + $0xc0] sm:$0xff]  ;;  %p824_p13 = pneg %p823_p12 }
  0x1c   : > { %708 = vmatprep.subr.mxu0 %v180_v4  ;;  %768 = vmatprep.subr.mxu1 %v180_v4  ;;  %v154_v26 = vld [vmem:[%s974_s17 + $0x48] sm:$0xff]  ;;  %v155_v28 = vld [vmem:[%s974_s17 + $0x50] sm:$0xff]  ;;  %v156_v30 = vld [vmem:[%s974_s17 + $0x58] sm:$0xff] }
  0x1d   : > { %709 = vmatpush3.msra.mxu0 %v180_v4  ;;  %776 = vmatpush3.msra.mxu1 %v180_v4  ;;  %v170_v27 = vld [vmem:[%s974_s17 + $0xc8] sm:$0xff]  ;;  %v171_v29 = vld [vmem:[%s974_s17 + $0xd0] sm:$0xff]  ;;  %v172_v31 = vld [vmem:[%s974_s17 + $0xd8] sm:$0xff]  ;;  %p831_p3 = pnand %p830_p2, %p824_p13 }
  0x1e   : > { %710 = vmatprep.subr.mxu0 %v179_v5  ;;  %769 = vmatprep.subr.mxu1 %v179_v5  ;;  %v157_v32 = vld [vmem:[%s974_s17 + $0x60] sm:$0xff]  ;;  %v158_v34 = vld [vmem:[%s974_s17 + $0x68] sm:$0xff]  ;;  %v159_v36 = vld [vmem:[%s974_s17 + $0x70] sm:$0xff] }
  0x1f   : > { %711 = vmatpush3.msra.mxu0 %v179_v5  ;;  %777 = vmatpush3.msra.mxu1 %v179_v5  ;;  %v173_v33 = vld [vmem:[%s974_s17 + $0xe0] sm:$0xff]  ;;  %v174_v35 = vld [vmem:[%s974_s17 + $0xe8] sm:$0xff]  ;;  %v175_v37 = vld [vmem:[%s974_s17 + $0xf0] sm:$0xff] }
  0x20   : > { %712 = vmatprep.subr.mxu0 %v178_v6  ;;  %770 = vmatprep.subr.mxu1 %v178_v6  ;;  %v160_v38 = vld [vmem:[%s974_s17 + $0x78] sm:$0xff] }
  0x21   : > { %713 = vmatpush3.msra.mxu0 %v178_v6  ;;  %778 = vmatpush3.msra.mxu1 %v178_v6  ;;  %v176_v39 = vld [vmem:[%s974_s17 + $0xf8] sm:$0xff] }
  0x22   : > { %714 = vmatprep.subr.mxu0 %v177_v7  ;;  %771 = vmatprep.subr.mxu1 %v177_v7 }
  0x23   : > { %715 = vmatpush3.msra.mxu0 %v177_v7  ;;  %779 = vmatpush3.msra.mxu1 %v177_v7 }
  0x24   : > { %716 = vmatprep.mubr.msk.f32.mxu0 %vm185_vm0, %v145_v8  ;;  %740 = vmatprep.mubr.msk.f32.mxu1 %vm185_vm0, %v161_v9 }
  0x25   : > { %717 = vmatmul.mubr.msk.f32.vlgmr.msra.gmra.mxu0 %vm185_vm0, %v146_v10  ;;  %741 = vmatmul.mubr.msk.f32.vlgmr.msra.gmra.mxu1 %vm185_vm0, %v162_v11 }
  0x26   : > { %719 = vmatprep.mubr.msk.f32.mxu0 %vm185_vm0, %v147_v12  ;;  %743 = vmatprep.mubr.msk.f32.mxu1 %vm185_vm0, %v163_v13 }
  0x29   : > { %720 = vmatmul.mubr.msk.f32.gmra.mxu0 %vm185_vm0, %v148_v14  ;;  %744 = vmatmul.mubr.msk.f32.gmra.mxu1 %vm185_vm0, %v164_v15 }
  0x2a   : > { %722 = vmatprep.mubr.msk.f32.mxu0 %vm185_vm0, %v149_v16  ;;  %746 = vmatprep.mubr.msk.f32.mxu1 %vm185_vm0, %v165_v17 }
  0x2d   : > { %723 = vmatmul.mubr.msk.f32.gmra.mxu0 %vm185_vm0, %v150_v18  ;;  %747 = vmatmul.mubr.msk.f32.gmra.mxu1 %vm185_vm0, %v166_v19 }
  0x2e   : > { %725 = vmatprep.mubr.msk.f32.mxu0 %vm185_vm0, %v151_v20  ;;  %749 = vmatprep.mubr.msk.f32.mxu1 %vm185_vm0, %v167_v21 }
  0x31   : > { %726 = vmatmul.mubr.msk.f32.gmra.mxu0 %vm185_vm0, %v152_v22  ;;  %750 = vmatmul.mubr.msk.f32.gmra.mxu1 %vm185_vm0, %v168_v23 }
  0x32   : > { %728 = vmatprep.mubr.msk.f32.mxu0 %vm185_vm0, %v153_v24  ;;  %752 = vmatprep.mubr.msk.f32.mxu1 %vm185_vm0, %v169_v25 }
  0x35   : > { %729 = vmatmul.mubr.msk.f32.gmra.mxu0 %vm185_vm0, %v154_v26  ;;  %753 = vmatmul.mubr.msk.f32.gmra.mxu1 %vm185_vm0, %v170_v27 }
  0x36   : > { %731 = vmatprep.mubr.msk.f32.mxu0 %vm185_vm0, %v155_v28  ;;  %755 = vmatprep.mubr.msk.f32.mxu1 %vm185_vm0, %v171_v29 }
  0x39   : > { %732 = vmatmul.mubr.msk.f32.gmra.mxu0 %vm185_vm0, %v156_v30  ;;  %756 = vmatmul.mubr.msk.f32.gmra.mxu1 %vm185_vm0, %v172_v31 }
  0x3a   : > { %734 = vmatprep.mubr.msk.f32.mxu0 %vm185_vm0, %v157_v32  ;;  %758 = vmatprep.mubr.msk.f32.mxu1 %vm185_vm0, %v173_v33 }
  0x3d   : > { %735 = vmatmul.mubr.msk.f32.gmra.mxu0 %vm185_vm0, %v158_v34  ;;  %759 = vmatmul.mubr.msk.f32.gmra.mxu1 %vm185_vm0, %v174_v35 }
  0x3e   : > { %737 = vmatprep.mubr.msk.f32.mxu0 %vm185_vm0, %v159_v36  ;;  %761 = vmatprep.mubr.msk.f32.mxu1 %vm185_vm0, %v175_v37 }
  0x41   : > { %738 = vmatmul.mubr.msk.f32.gmra.mxu0 %vm185_vm0, %v160_v38  ;;  %762 = vmatmul.mubr.msk.f32.gmra.mxu1 %vm185_vm0, %v176_v39 }
  0xe5   : > { %v718_v40 = vpop.f32.mrf.mxu0  ;;  %v742_v41 = vpop.f32.mrf.mxu1 }
  0xe6   : > { %508 = vst [vmem:[%s1046_s25 + $0x8] sm:$0xff] %v718_v40  ;;  %524 = vst [vmem:[%s1046_s25 + $0x88] sm:$0xff] %v742_v41 }
  0xe7   : > { %v348_v42 = vpop.f32.mrf.mxu0  ;;  %v428_v43 = vpop.f32.mrf.mxu1 }
  0xe8   : > { %507 = vst [vmem:[%s1046_s25] sm:$0xff] %v348_v42  ;;  %523 = vst [vmem:[%s1046_s25 + $0x80] sm:$0xff] %v428_v43 }
  0xe9   : > { %v721_v44 = vpop.f32.mrf.mxu0  ;;  %v745_v45 = vpop.f32.mrf.mxu1 }
  0xea   : > { %510 = vst [vmem:[%s1046_s25 + $0x18] sm:$0xff] %v721_v44  ;;  %526 = vst [vmem:[%s1046_s25 + $0x98] sm:$0xff] %v745_v45 }
  0xeb   : > { %v358_v46 = vpop.f32.mrf.mxu0  ;;  %v438_v47 = vpop.f32.mrf.mxu1 }
  0xec   : > { %509 = vst [vmem:[%s1046_s25 + $0x10] sm:$0xff] %v358_v46  ;;  %525 = vst [vmem:[%s1046_s25 + $0x90] sm:$0xff] %v438_v47 }
  0xed   : > { %v724_v48 = vpop.f32.mrf.mxu0  ;;  %v748_v49 = vpop.f32.mrf.mxu1 }
  0xee   : > { %512 = vst [vmem:[%s1046_s25 + $0x28] sm:$0xff] %v724_v48  ;;  %528 = vst [vmem:[%s1046_s25 + $0xa8] sm:$0xff] %v748_v49 }
  0xef   : > { %v368_v50 = vpop.f32.mrf.mxu0  ;;  %v448_v51 = vpop.f32.mrf.mxu1 }
  0xf0   : > { %511 = vst [vmem:[%s1046_s25 + $0x20] sm:$0xff] %v368_v50  ;;  %527 = vst [vmem:[%s1046_s25 + $0xa0] sm:$0xff] %v448_v51 }
  0xf1   : > { %v727_v52 = vpop.f32.mrf.mxu0  ;;  %v751_v53 = vpop.f32.mrf.mxu1 }
  0xf2   : > { %514 = vst [vmem:[%s1046_s25 + $0x38] sm:$0xff] %v727_v52  ;;  %530 = vst [vmem:[%s1046_s25 + $0xb8] sm:$0xff] %v751_v53 }
  0xf3   : > { %v378_v54 = vpop.f32.mrf.mxu0  ;;  %v458_v55 = vpop.f32.mrf.mxu1 }
  0xf4   : > { %513 = vst [vmem:[%s1046_s25 + $0x30] sm:$0xff] %v378_v54  ;;  %529 = vst [vmem:[%s1046_s25 + $0xb0] sm:$0xff] %v458_v55 }
  0xf5   : > { %v730_v56 = vpop.f32.mrf.mxu0  ;;  %v754_v57 = vpop.f32.mrf.mxu1 }
  0xf6   : > { %516 = vst [vmem:[%s1046_s25 + $0x48] sm:$0xff] %v730_v56  ;;  %532 = vst [vmem:[%s1046_s25 + $0xc8] sm:$0xff] %v754_v57 }
  0xf7   : > { %v388_v58 = vpop.f32.mrf.mxu0  ;;  %v468_v59 = vpop.f32.mrf.mxu1 }
  0xf8   : > { %515 = vst [vmem:[%s1046_s25 + $0x40] sm:$0xff] %v388_v58  ;;  %531 = vst [vmem:[%s1046_s25 + $0xc0] sm:$0xff] %v468_v59 }
  0xf9   : > { %v733_v60 = vpop.f32.mrf.mxu0  ;;  %v757_v61 = vpop.f32.mrf.mxu1 }
  0xfa   : > { %518 = vst [vmem:[%s1046_s25 + $0x58] sm:$0xff] %v733_v60  ;;  %534 = vst [vmem:[%s1046_s25 + $0xd8] sm:$0xff] %v757_v61 }
  0xfb   : > { %v398_v62 = vpop.f32.mrf.mxu0  ;;  %v478_v63 = vpop.f32.mrf.mxu1 }
  0xfc   : > { %517 = vst [vmem:[%s1046_s25 + $0x50] sm:$0xff] %v398_v62  ;;  %533 = vst [vmem:[%s1046_s25 + $0xd0] sm:$0xff] %v478_v63 }
  0xfd   : > { %v736_v0 = vpop.f32.mrf.mxu0  ;;  %v760_v1 = vpop.f32.mrf.mxu1 }
  0xfe   : > { %520 = vst [vmem:[%s1046_s25 + $0x68] sm:$0xff] %v736_v0  ;;  %536 = vst [vmem:[%s1046_s25 + $0xe8] sm:$0xff] %v760_v1 }
  0xff   : > { %v408_v2 = vpop.f32.mrf.mxu0  ;;  %v488_v3 = vpop.f32.mrf.mxu1 }
 0x100   : > { %519 = vst [vmem:[%s1046_s25 + $0x60] sm:$0xff] %v408_v2  ;;  %535 = vst [vmem:[%s1046_s25 + $0xe0] sm:$0xff] %v488_v3 }
 0x101   : > { %v739_v4 = vpop.f32.mrf.mxu0  ;;  %v763_v5 = vpop.f32.mrf.mxu1 }
 0x102   : > { %522 = vst [vmem:[%s1046_s25 + $0x78] sm:$0xff] %v739_v4  ;;  %538 = vst [vmem:[%s1046_s25 + $0xf8] sm:$0xff] %v763_v5 }
 0x103   : > { %v418_v6 = vpop.f32.mrf.mxu0  ;;  %v498_v7 = vpop.f32.mrf.mxu1 }
 0x104   : > { %521 = vst [vmem:[%s1046_s25 + $0x70] sm:$0xff] %v418_v6  ;;  %537 = vst [vmem:[%s1046_s25 + $0xf0] sm:$0xff] %v498_v7 }
 0x105   : > { %834 = shalt.err (!%p831_p3)
}
 0x106   : > { %s835_s7 = scalar_lea.hbm %s1081_s30, 4096  ;;  %s839_s16 = scalar_lea.hbm %s1133_s2, 8192 }
 0x107   : > { %p836_p4 = scmp.ne.s32.totalorder %s1081_s30, %s835_s7  ;;  %p840_p9 = scmp.lt.s32.totalorder %s1081_s30, %s1133_s2 }
 0x108   : > { %p841_p10 = scmp.lt.s32.totalorder %s839_s16, %s835_s7 }
 0x109   : > { %p837_p7 = pnand %p836_p4, %p939_p5 }
 0x10a   : > { %p842_p11 = por %p841_p10, %p840_p9 }
 0x10b   : > { %p838_p8 = pneg %p837_p7 }
 0x10d   : > { %p843_p12 = pnand %p842_p11, %p838_p8 }
 0x10f   : > { %846 = shalt.err (!%p843_p12)
}
 0x110   : > { %s884_s22 = smov 128   ;;  %s885_s23 = smov 8  }
 0x111   : > { %780 = dma.vmem_to_hbm [thread:$0]  (%p939_p5), %s1083_s27, 4096, %s1081_s30, %s1091_s13, %s884_s22, %s884_s22, %s885_s23  }
 0x112 PF: > { %p786_p13 = scmp.ge.s32.totalorder %s881_s12, 2  ;;  %s568_s24 = sand.u32 1, %s869_s9  }
 0x113   : > { %s569_s25 = scalar_lea.sflag [#allocation3], %s568_s24 }
 0x114   : > { %p783_p0 = pnand %p786_p13, %p943_p6 }
 0x116   : > { %p784_p1 = pneg %p783_p0 }
 0x118   : > { %864 = dma.done.wait (%p784_p1), %s569_s25, 4096  }
 0x119   : > { %866 = vsyncadd (%p784_p1), %s569_s25, 4294963200  ;;  %p12_p2 = scmp.ge.s32.totalorder %s926_s15, 4   ;;  %s1136_s9 = smov %s873_s10 }
 0x11a   : > { %s1137_s10 = smov %s877_s11  ;;  %s1138_s11 = smov %s937_s18 }
 0x11b   : > { %s1139_s12 = smov %s926_s15  ;;  %14 = sbr.rel (!%p12_p2) target bundleno = 3 (0x3), region = 63 }
 0x120   :  { %574 = vsyncpa [#allocation3], 1 }
 0x121   :  { %576 = vsyncpa [#allocation3 + $0x1], 1 }

</bundles_post_ra>
